<compile_context>
chip_gen: v7x
topology: tpu7x:2x2x1
jax: 0.10.0
libtpu: 0.0.40
codegen_flags: <defaults>
</compile_context>

<pallas_src>
import functools

import jax
import jax.numpy as jnp
from jax.experimental import pallas as pl
from jax.experimental.pallas import tpu as pltpu


# ----------------------------- Pallas kernel -------------------------------

def _apply_activation(z, activation):
    if activation == 'relu':
        return jnp.maximum(z, 0.0)
    if activation == 'tanh':
        return jnp.tanh(z)
    if activation == 'sigmoid':
        return jax.nn.sigmoid(z)
    if activation == 'none':
        return z
    raise NameError('activation ' + str(activation) + ' not supported')


def _fused_conv_act_pool_kernel(rhs_ref, w_ref, b_ref, o_ref, *,
                                activation, pool, num_phases, lane_width):
    """Single invocation over the whole (small) batch.

    rhs_ref : (Kp, num_phases*lane_width) bf16
              phase-major im2col slabs; lane order is [phase, image, spatial],
              each phase slab zero-padded to `lane_width` (a multiple of 128).
    w_ref   : (Cout, Kp) bf16  -- conv weight, contraction dim zero-padded.
    b_ref   : (Cout, 1)  f32   -- bias column.
    o_ref   : (Cout, lane_width) f32 -- pooled output, lanes = [image, spatial].
    """
    # One MXU dot amortizing a single weight load over all phases/images.
    z = jnp.dot(w_ref[...], rhs_ref[...], preferred_element_type=jnp.float32)
    # Bias broadcast + activation once over the full slab (single VPU pass).
    z = _apply_activation(z + b_ref[...], activation)
    # 2x2 pool = elementwise reduce over the four 128-lane-aligned phase slices.
    acc = z[:, 0:lane_width]
    for ph in range(1, num_phases):
        s = z[:, ph * lane_width:(ph + 1) * lane_width]
        acc = (acc + s) if pool == 'Avg' else jnp.maximum(acc, s)
    if pool == 'Avg':
        acc = acc * (1.0 / num_phases)
    o_ref[...] = acc.astype(o_ref.dtype)


# ------------------------------- glue (JAX) --------------------------------

def _round_up(v, m):
    return (v + m - 1) // m * m


def _build_phase_rhs(x, kh, kw, stride, padding, *, lane_align=128, k_align=64):
    """x (N,C,H,W) -> lane-dense, phase-major transposed im2col RHS.

    Returns rhs of shape (Kp, 4*Lp) with
      rhs[k, ph*Lp + n*Hp*Wp + s] = patch element k for pool-phase ph,
                                    image n, pooled spatial position s,
    zero-padded along K (-> Kp) and per-phase lanes (-> Lp)."""
    N, C, H, W = x.shape
    xp = jnp.pad(x, ((0, 0), (0, 0), (padding, padding), (padding, padding)))
    Ho = (H + 2 * padding - kh) // stride + 1
    Wo = (W + 2 * padding - kw) // stride + 1
    Hp, Wp = Ho // 2, Wo // 2                     # PyTorch pool floor behaviour
    K = C * kh * kw
    cols = [xp[:, :, ki:ki + stride * Ho:stride, kj:kj + stride * Wo:stride]
            for ki in range(kh) for kj in range(kw)]          # each (N,C,Ho,Wo)
    pt = jnp.stack(cols, axis=2).reshape(N, K, Ho, Wo)        # (N, K, Ho, Wo)
    phases = [pt[:, :, pi:2 * Hp:2, pj:2 * Wp:2].reshape(N, K, Hp * Wp)
              for pi in range(2) for pj in range(2)]          # each (N, K, HpWp)
    p = jnp.stack(phases, axis=0)                             # (4, N, K, HpWp)
    p = jnp.transpose(p, (2, 0, 1, 3))                        # (K, 4, N, HpWp)
    L = N * Hp * Wp
    Lp = _round_up(L, lane_align)
    Kp = _round_up(K, k_align)
    p = p.reshape(K, 4, L)
    p = jnp.pad(p, ((0, Kp - K), (0, 0), (0, Lp - L)))        # zero K & lane pad
    rhs = p.reshape(Kp, 4 * Lp)
    return rhs, Hp, Wp, K, Kp, L, Lp


def cnn_block_forward(x, weight, bias, *, stride=1, padding=1,
                      activation='relu', pool='Max',
                      mxu_dtype=jnp.bfloat16):
    """Pallas implementation of CNN_block.forward (labels=None path)."""
    N, Cin, H, W = x.shape
    Cout, _, kh, kw = weight.shape

    rhs, Hp, Wp, K, Kp, L, Lp = _build_phase_rhs(x, kh, kw, stride, padding)
    rhs = rhs.astype(mxu_dtype)                               # (Kp, 4*Lp)

    w_t = weight.reshape(Cout, K).astype(mxu_dtype)           # (Cout, K)
    w_t = jnp.pad(w_t, ((0, 0), (0, Kp - K)))                 # (Cout, Kp)
    b_col = (bias if bias is not None
             else jnp.zeros((Cout,), jnp.float32)).astype(jnp.float32).reshape(Cout, 1)

    out_slab = pl.pallas_call(
        functools.partial(_fused_conv_act_pool_kernel,
                          activation=activation, pool=pool,
                          num_phases=4, lane_width=Lp),
        out_shape=jax.ShapeDtypeStruct((Cout, Lp), jnp.float32),
        grid=(1,),                                            # single lane-dense step
        in_specs=[
            pl.BlockSpec((Kp, 4 * Lp), lambda i: (0, 0)),
            pl.BlockSpec((Cout, Kp), lambda i: (0, 0)),
            pl.BlockSpec((Cout, 1), lambda i: (0, 0)),
        ],
        out_specs=pl.BlockSpec((Cout, Lp), lambda i: (0, 0)),
        compiler_params=pltpu.CompilerParams(
            dimension_semantics=("arbitrary",)),
    )(rhs, w_t, b_col)

    # Lanes are [image, spatial]; tiny (4 KiB) post-kernel slice + transpose to
    # NCHW.  TODO(synk): at real sizes let the consumer take the lane-dense
    # (Cout, N*Hp*Wp) slab directly or fold this transpose into the next layer.
    out = out_slab[:, :L].reshape(Cout, N, Hp, Wp)
    return jnp.transpose(out, (1, 0, 2, 3))


# --------------------------------- main -------------------------------------

if __name__ == "__main__":
    key = jax.random.PRNGKey(0)
    k_x, k_w, k_b, k_ni = jax.random.split(key, 4)

    # Module config (small, consistent with CNN_block.__init__):
    N, Cin, H, W = 2, 4, 16, 16
    Cout, ksz, stride, padding = 8, 3, 1, 1
    activation, pool = 'relu', 'Max'

    x = jax.random.normal(k_x, (N, Cin, H, W), dtype=jnp.float32)
    weight = jax.random.normal(k_w, (Cout, Cin, ksz, ksz), dtype=jnp.float32) * 0.1
    bias = jax.random.normal(k_b, (Cout,), dtype=jnp.float32) * 0.1

    # NI parameter (dim_hook), 'uniform' init -- unused in forward output.
    # TODO(synk): gradient-injection via labels/NI is backward-only; not modeled.
    num_classes = 10
    NI = jax.random.uniform(k_ni, (2 * num_classes, Cout, H, W), dtype=jnp.float32)

    fwd = jax.jit(functools.partial(cnn_block_forward, stride=stride,
                                    padding=padding, activation=activation,
                                    pool=pool))
    out = jax.block_until_ready(fwd(x, weight, bias))

    # Pure-JAX reference.  The kernel feeds the MXU bf16 inputs (f32 accumulate),
    # so the reference uses bf16-rounded x/weight: products are then exact in
    # f32 and only accumulation order differs (~1e-6).
    xr = x.astype(jnp.bfloat16).astype(jnp.float32)
    wr = weight.astype(jnp.bfloat16).astype(jnp.float32)
    ref = jax.lax.conv_general_dilated(
        xr, wr, (stride, stride), [(padding, padding), (padding, padding)],
        dimension_numbers=('NCHW', 'OIHW', 'NCHW'),
        precision=jax.lax.Precision.HIGHEST) + bias.reshape(1, Cout, 1, 1)
    ref = jnp.maximum(ref, 0.0)
    ref = jax.lax.reduce_window(ref, -jnp.inf, jax.lax.max,
                                (1, 1, 2, 2), (1, 1, 2, 2), 'VALID')

    assert out.shape == (N, Cout, H // 2, W // 2), out.shape
    max_err = float(jnp.max(jnp.abs(out - ref)))
    assert jnp.allclose(out, ref, atol=1e-3, rtol=1e-3), max_err

    print("KERNEL_OK")
</pallas_src>

<mosaic_0001>
module attributes {stable_mosaic.version = 11 : i64} {
  func.func @_fused_conv_act_pool_kernel(%arg0: i32, %arg1: memref<64x512xbf16, #tpu.memory_space<vmem>>, %arg2: memref<8x64xbf16, #tpu.memory_space<vmem>>, %arg3: memref<8x1xf32, #tpu.memory_space<vmem>>, %arg4: memref<8x128xf32, #tpu.memory_space<vmem>>) attributes {dimension_semantics = [#tpu.dimension_semantics<arbitrary>], iteration_bounds = array<i64: 1>, scalar_prefetch = 0 : i64, scratch_operands = 0 : i64, tpu.core_type = #tpu.core_type<tc>, window_params = [{pipeline_mode = #tpu.pipeline_mode<synchronous>, transform_indices = @transform_0, window_bounds = array<i64: 64, 512>}, {pipeline_mode = #tpu.pipeline_mode<synchronous>, transform_indices = @transform_1, window_bounds = array<i64: 8, 64>}, {pipeline_mode = #tpu.pipeline_mode<synchronous>, transform_indices = @transform_2, window_bounds = array<i64: 8, 1>}, {pipeline_mode = #tpu.pipeline_mode<synchronous>, transform_indices = @transform_3, window_bounds = array<i64: 8, 128>}]} {
    %c0 = arith.constant 0 : index
    %c0_0 = arith.constant 0 : index
    %0 = vector.load %arg2[%c0, %c0_0] : memref<8x64xbf16, #tpu.memory_space<vmem>>, vector<8x64xbf16>
    %c0_1 = arith.constant 0 : index
    %c0_2 = arith.constant 0 : index
    %1 = vector.load %arg1[%c0_1, %c0_2] : memref<64x512xbf16, #tpu.memory_space<vmem>>, vector<64x512xbf16>
    %cst = arith.constant dense<0.000000e+00> : vector<8x512xf32>
    %2 = tpu.matmul %0, %1, %cst {dimension_numbers = #tpu.dot_dimension_numbers<[1], [0], [0], [1], [0, 0, 1, 1], [], []>} : vector<8x64xbf16>, vector<64x512xbf16>, vector<8x512xf32> -> vector<8x512xf32>
    %c0_3 = arith.constant 0 : index
    %c0_4 = arith.constant 0 : index
    %3 = vector.load %arg3[%c0_3, %c0_4] : memref<8x1xf32, #tpu.memory_space<vmem>>, vector<8x1xf32>
    %4 = vector.broadcast %3 : vector<8x1xf32> to vector<8x512xf32>
    %5 = arith.addf %2, %4 : vector<8x512xf32>
    %cst_5 = arith.constant 0.000000e+00 : f32
    %6 = vector.broadcast %cst_5 : f32 to vector<8x512xf32>
    %7 = arith.maximumf %5, %6 : vector<8x512xf32>
    %8 = vector.extract_strided_slice %7 {offsets = [0, 0], sizes = [8, 128], strides = [1, 1]} : vector<8x512xf32> to vector<8x128xf32>
    %9 = vector.extract_strided_slice %7 {offsets = [0, 128], sizes = [8, 128], strides = [1, 1]} : vector<8x512xf32> to vector<8x128xf32>
    %10 = arith.maximumf %8, %9 : vector<8x128xf32>
    %11 = vector.extract_strided_slice %7 {offsets = [0, 256], sizes = [8, 128], strides = [1, 1]} : vector<8x512xf32> to vector<8x128xf32>
    %12 = arith.maximumf %10, %11 : vector<8x128xf32>
    %13 = vector.extract_strided_slice %7 {offsets = [0, 384], sizes = [8, 128], strides = [1, 1]} : vector<8x512xf32> to vector<8x128xf32>
    %14 = arith.maximumf %12, %13 : vector<8x128xf32>
    %c0_6 = arith.constant 0 : index
    %c0_7 = arith.constant 0 : index
    %15 = vector.load %arg4[%c0_6, %c0_7] : memref<8x128xf32, #tpu.memory_space<vmem>>, vector<8x128xf32>
    tpu.vector_store %arg4[%c0_6, %c0_7], %14 {strides = array<i32>} : memref<8x128xf32, #tpu.memory_space<vmem>>, vector<8x128xf32>,
    return
  }
  func.func @transform_0(%arg0: i32) -> (i32, i32) {
    %c0_i32 = arith.constant 0 : i32
    %c0_i32_0 = arith.constant 0 : i32
    %c0_i32_1 = arith.constant 0 : i32
    return %c0_i32, %c0_i32_0 : i32, i32
  }
  func.func @transform_1(%arg0: i32) -> (i32, i32) {
    %c0_i32 = arith.constant 0 : i32
    %c0_i32_0 = arith.constant 0 : i32
    %c0_i32_1 = arith.constant 0 : i32
    return %c0_i32, %c0_i32_0 : i32, i32
  }
  func.func @transform_2(%arg0: i32) -> (i32, i32) {
    %c0_i32 = arith.constant 0 : i32
    %c0_i32_0 = arith.constant 0 : i32
    %c0_i32_1 = arith.constant 0 : i32
    return %c0_i32, %c0_i32_0 : i32, i32
  }
  func.func @transform_3(%arg0: i32) -> (i32, i32) {
    %c0_i32 = arith.constant 0 : i32
    %c0_i32_0 = arith.constant 0 : i32
    %c0_i32_1 = arith.constant 0 : i32
    return %c0_i32, %c0_i32_0 : i32, i32
  }
}

</mosaic_0001>

<bundles_post_ra>
// kernel: cnn_block_forward.1
= control target key start
LH: loop header
LB: loop body
LE: loop exit
PB: predicated region body
PF: predicated region fallthrough
CT: control target
= control target key end

     0   :  { %v260_v1 = vmov 0   ;;  %vm118_vm0 = vcmask 523264   ;;  %s338_s0 = inlined_call_operand.vmem [shape: bf16[64,512], index: 0, kind: input, shape index: {}]   ;;  %s339_s2 = inlined_call_operand.vmem [shape: f32[8,1], index: 2, kind: input, shape index: {}]   ;;  %s340_s1 = inlined_call_operand.vmem [shape: bf16[8,64], index: 1, kind: input, shape index: {}]   ;;  %s341_s3 = inlined_call_operand.vmem [shape: f32[8,128], index: 3, kind: output, shape index: {}]  }
   0x1   :  { %v236_v0 = vld [vmem:[%s338_s0 + $0x4] ss:$16 sps:$4 sm:$0xff]   ;;  %154 = vmatprep.mubr.bf16.mxu0 %v260_v1  ;;  %195 = vmatprep.mubr.bf16.mxu1 %v260_v1  ;;  %v238_v2 = vld [vmem:[%s338_s0 + $0xc] ss:$16 sps:$4 sm:$0xff]   ;;  %v240_v3 = vld [vmem:[%s338_s0] ss:$16 sps:$4 sm:$0xff]  }
   0x2   :  { %235 = vset.pattern.permute.xlu0 %v260_v1  ;;  %122 = vmatprep.subr.bf16.mxu0 %v236_v0  ;;  %v241_v4 = vld [vmem:[%s338_s0 + $0x8] ss:$16 sps:$4 sm:$0xff]   ;;  %v242_v5 = vld [vmem:[%s338_s0 + $0x24] ss:$16 sps:$4 sm:$0xff]   ;;  %v244_v6 = vld [vmem:[%s338_s0 + $0x2c] ss:$16 sps:$4 sm:$0xff]  }
   0x3   :  { %163 = vmatprep.subr.bf16.mxu1 %v238_v2  ;;  %123 = vmatpush1.bf16.msra.mxu0 %v240_v3  ;;  %v246_v7 = vld [vmem:[%s338_s0 + $0x20] ss:$16 sps:$4 sm:$0xff]   ;;  %v247_v8 = vld [vmem:[%s338_s0 + $0x28] ss:$16 sps:$4 sm:$0xff]   ;;  %v248_v9 = vld [vmem:[%s338_s0 + $0x44] ss:$16 sps:$4 sm:$0xff]  }
   0x4   :  { %164 = vmatpush1.bf16.msra.mxu1 %v241_v4  ;;  %124 = vmatprep.subr.bf16.mxu0 %v242_v5  ;;  %v250_v10 = vld [vmem:[%s338_s0 + $0x4c] ss:$16 sps:$4 sm:$0xff]   ;;  %v252_v11 = vld [vmem:[%s338_s0 + $0x40] ss:$16 sps:$4 sm:$0xff]   ;;  %v253_v12 = vld [vmem:[%s338_s0 + $0x48] ss:$16 sps:$4 sm:$0xff]  }
   0x5   :  { %165 = vmatprep.subr.bf16.mxu1 %v244_v6  ;;  %v254_v13 = vld [vmem:[%s338_s0 + $0x64] ss:$16 sps:$4 sm:$0xff]   ;;  %v256_v14 = vld [vmem:[%s338_s0 + $0x6c] ss:$16 sps:$4 sm:$0xff]   ;;  %v258_v16 = vld [vmem:[%s338_s0 + $0x60] ss:$16 sps:$4 sm:$0xff]  }
   0x6   :  { %v32_v15 = vld [vmem:[%s339_s2] sm:$0xff]  ;;  %v259_v17 = vld [vmem:[%s338_s0 + $0x68] ss:$16 sps:$4 sm:$0xff]  }
   0x7   :  { %125 = vmatpush1.bf16.msra.mxu0 %v246_v7  ;;  %35 = vperm.xlu0 %235, %v32_v15   ;;  %v15_v18 = vld [vmem:[%s340_s1] sm:$0xf] }
   0x8   :  { %166 = vmatpush1.bf16.msra.mxu1 %v247_v8  ;;  %126 = vmatprep.subr.bf16.mxu0 %v248_v9 }
   0x9   :  { %167 = vmatprep.subr.bf16.mxu1 %v250_v10 }
   0xb   :  { %127 = vmatpush1.bf16.msra.mxu0 %v252_v11 }
   0xc   :  { %168 = vmatpush1.bf16.msra.mxu1 %v253_v12  ;;  %128 = vmatprep.subr.bf16.mxu0 %v254_v13 }
   0xd   :  { %169 = vmatprep.subr.bf16.mxu1 %v256_v14 }
   0xf   :  { %129 = vmatpush1.bf16.msra.mxu0 %v258_v16 }
  0x10   :  { %170 = vmatpush1.bf16.msra.mxu1 %v259_v17 }
  0x12   :  { %232 = vmatmul.mubr.msk.bf16.vlgmr.msra.gmra.mrb[0].mxu0 %vm118_vm0, %v15_v18 }
  0x13   :  { %233 = vmatmul.mubr.msk.bf16.vlgmr.msra.gmra.mrb[0].mxu1 %vm118_vm0, %v15_v18 }
  0x86   :  { %v36_v19 = vpop.permute.xlu0 %35 }
  0xe5   :  { %v156_v20 = vpop.f32.mrb[0].mxu0 }
  0xe6   :  { %v197_v21 = vpop.f32.mrb[0].mxu1  ;;  %v157_v22 = vadd.f32 %v156_v20, %v36_v19  ;;  %v158_v23 = vpop.f32.mrb[1].mxu0 }
  0xe7   :  { %v199_v24 = vpop.f32.mrb[1].mxu1  ;;  %v198_v25 = vadd.f32 %v197_v21, %v36_v19  ;;  %v159_v26 = vadd.f32 %v158_v23, %v36_v19  ;;  %v160_v27 = vpop.f32.mrb[2].mxu0 }
  0xe8   :  { %v201_v28 = vpop.f32.mrb[2].mxu1  ;;  %v204_v29 = vmax.f32 %v157_v22, 0.0  ;;  %v161_v30 = vpop.f32.mrb[3].mxu0  ;;  %v200_v33 = vadd.f32 %v199_v24, %v36_v19 }
  0xe9   :  { %v202_v31 = vpop.f32.mrb[3].mxu1  ;;  %v205_v32 = vmax.f32 %v159_v26, 0.0  ;;  %v206_v34 = vmax.f32 %v198_v25, 0.0 }
  0xea   :  { %v207_v36 = vmax.f32 %v200_v33, 0.0 }
  0xeb   :  { %v208_v35 = vmax.f32 %v204_v29, %v205_v32 }
  0xed   :  { %v209_v37 = vmax.f32 %v208_v35, %v206_v34 }
  0xef   :  { %v210_v38 = vmax.f32 %v209_v37, %v207_v36 }
  0xf1   :  { %211 = vst [vmem:[%s341_s3] sm:$0xff] %v210_v38 }

</bundles_post_ra>
